<compile_context>
chip_gen: v7x
topology: tpu7x:2x2x1
jax: 0.10.0
libtpu: 0.0.40
codegen_flags: <defaults>
</compile_context>

<pallas_src>
import numpy as np

import jax
import jax.numpy as jnp
from jax.experimental import pallas as pl
from jax.experimental.pallas import tpu as pltpu


def _make_kernel(W: int, bt: int):
    """Kernel over blocks: corners (8, bc, bt, HoWo) -> pooled / spatial idx / temporal idx."""

    def kernel(base_ref, xc_ref, pool_ref, sidx_ref, tidx_ref):
        # base_ref : (1, 1, HoWo) int32 -- flat HxW index of each window's top-left.
        # xc_ref   : (8, bc, bt, HoWo)  -- window corners, plane index = dt*4 + dh*2 + dw.
        # pool_ref : (bc, bt, HoWo)      pooled values.
        # sidx_ref : (bc, bt, 2*HoWo)    spatial argmax, [even-t plane | odd-t plane].
        # tidx_ref : (bc, bt, HoWo)      temporal argmax (absolute t).
        base = base_ref[...]

        def spatial(dt):
            v00 = xc_ref[dt * 4 + 0]
            v01 = xc_ref[dt * 4 + 1]
            v10 = xc_ref[dt * 4 + 2]
            v11 = xc_ref[dt * 4 + 3]
            # PyTorch tie-break: first element of the row-major window scan wins,
            # hence strict '<' everywhere.
            off0 = (v00 < v01).astype(jnp.int32)      # winning dw in row dh=0
            off1 = (v10 < v11).astype(jnp.int32)      # winning dw in row dh=1
            m0 = jnp.maximum(v00, v01)
            m1 = jnp.maximum(v10, v11)
            sv = jnp.maximum(m0, m1)
            si = base + jnp.where(m0 < m1, W + off1, off0)
            return sv, si

        sv0, si0 = spatial(0)      # even frames: t = 2*to
        sv1, si1 = spatial(1)      # odd  frames: t = 2*to + 1

        hw = si0.shape[-1]
        # Two contiguous halves of the lane dim: unmasked full-vreg stores whenever
        # Ho*Wo is a multiple of 128 (the realistic case).
        sidx_ref[:, :, :hw] = si0
        sidx_ref[:, :, hw:] = si1

        # Temporal max-pool between the two frame parities (tie -> even frame, as PyTorch).
        to_local = jax.lax.broadcasted_iota(jnp.int32, sv0.shape, 1)
        t_even = 2 * (pl.program_id(1) * bt + to_local)
        tidx_ref[...] = t_even + (sv0 < sv1).astype(jnp.int32)
        pool_ref[...] = jnp.maximum(sv0, sv1).astype(pool_ref.dtype)

    return kernel


def _divisors_desc(n: int):
    return [d for d in range(n, 0, -1) if n % d == 0]


def _pick_tiles(NC: int, To: int, HoWo: int, max_block_elems: int):
    """Pick (bc, bt): bc | NC; bt | To with bt == To or bt % 8 == 0 (sublane rule).
    Largest block under the VMEM budget, preferring >= 2 grid steps (v7x has 2 TCs)."""
    bt_opts = [d for d in _divisors_desc(To) if d == To or d % 8 == 0]
    bc_opts = _divisors_desc(NC)

    def search(need_multi):
        for bt in bt_opts:
            for bc in bc_opts:
                if bc * bt * HoWo > max_block_elems:
                    continue
                if need_multi and (NC // bc) * (To // bt) < 2:
                    continue
                return bc, bt
        return None

    return search(True) or search(False) or (bc_opts[-1], bt_opts[-1])


@jax.jit
def _maxpool4d_core(x):
    N, C, T, H, W = x.shape
    # PyTorch MaxPool(k=2, s=2, no padding) floors: odd trailing frame/row/col is dropped.
    To, Ho, Wo = T // 2, H // 2, W // 2
    if To < 1 or Ho < 1 or Wo < 1:
        raise ValueError("maxpool4d needs T, H, W >= 2.")
    x = x[:, :, : 2 * To, : 2 * Ho, : 2 * Wo]       # no-op for even shapes
    T, H, W = 2 * To, 2 * Ho, 2 * Wo
    NC, HoWo = N * C, Ho * Wo

    # --- corner gather: the single (cheap, fused) XLA relayout ----------------
    # (N,C,T,H,W) -> (dt*4+dh*2+dw, N*C, To, Ho*Wo).  Afterwards the kernel needs
    # no cross-lane shuffles and every vreg lane carries useful data.
    x7 = x.reshape(NC, To, 2, Ho, 2, Wo, 2)
    xc = jnp.transpose(x7, (2, 4, 6, 0, 1, 3, 5)).reshape(8, NC, To, HoWo)

    # Constant window-base plane: flat HxW index of each window's top-left corner
    # (hoisted out of the kernel entirely; a ~KiB-sized constant input).
    lane = np.arange(HoWo, dtype=np.int64)
    base_np = (2 * (lane // Wo) * W + 2 * (lane % Wo)).astype(np.int32)
    base = jnp.asarray(base_np).reshape(1, 1, HoWo)

    # --- tiling ----------------------------------------------------------------
    # Per grid step, double-buffered VMEM footprint is roughly
    #   2 * (8 corner planes * itemsize + pooled * itemsize + (sidx 2x + tidx) * 4B)
    # per block element; size blocks against a 16 MiB budget (scoped limit 32 MiB,
    # v7x physical VMEM is only 64 MiB so stay well inside).
    itemsize = np.dtype(x.dtype).itemsize
    bytes_per_block_elem = 2 * (9 * itemsize + 12)
    max_block_elems = max((16 * 1024 * 1024) // bytes_per_block_elem, HoWo)
    bc, bt = _pick_tiles(NC, To, HoWo, max_block_elems=max_block_elems)
    grid = (NC // bc, To // bt)

    pooled, sidx, tidx = pl.pallas_call(
        _make_kernel(W, bt),
        out_shape=(
            jax.ShapeDtypeStruct((NC, To, HoWo), x.dtype),
            jax.ShapeDtypeStruct((NC, To, 2 * HoWo), jnp.int32),
            jax.ShapeDtypeStruct((NC, To, HoWo), jnp.int32),
        ),
        grid=grid,
        in_specs=[
            pl.BlockSpec((1, 1, HoWo), lambda i, j: (0, 0, 0)),
            pl.BlockSpec((8, bc, bt, HoWo), lambda i, j: (0, i, j, 0)),
        ],
        out_specs=(
            pl.BlockSpec((bc, bt, HoWo), lambda i, j: (i, j, 0)),
            pl.BlockSpec((bc, bt, 2 * HoWo), lambda i, j: (i, j, 0)),
            pl.BlockSpec((bc, bt, HoWo), lambda i, j: (i, j, 0)),
        ),
        compiler_params=pltpu.CompilerParams(
            dimension_semantics=("parallel", "parallel"),
            vmem_limit_bytes=32 * 1024 * 1024,
        ),
    )(base, xc)

    # Free reshapes only -- the kernel already emits the final memory layouts.
    x_pool = pooled.reshape(N, C, To, Ho, Wo)
    inds_spatial = sidx.reshape(N, C, T, Ho, Wo)      # stacked over t
    inds_temporal = tidx.reshape(N, C, To, Ho, Wo)    # stacked over L = ho*Wo + wo
    return x_pool, inds_spatial, inds_temporal


def maxpool4d(x, as_lists: bool = False):
    """Forward of _MaxPool(X=2, temporal=True, all kernels/strides = 2).

    Default returns stacked index arrays (fast path).  as_lists=True reproduces the
    PyTorch module's Python-list structure for inds_spatial / inds_temporal.
    """
    x_pool, inds_spatial, inds_temporal = _maxpool4d_core(x)
    if not as_lists:
        return x_pool, inds_spatial, inds_temporal
    T = inds_spatial.shape[2]
    N, C, To, Ho, Wo = inds_temporal.shape
    tflat = inds_temporal.reshape(N, C, To, Ho * Wo)
    sp_list = [inds_spatial[:, :, t] for t in range(T)]
    tp_list = [tflat[..., L] for L in range(Ho * Wo)]
    return x_pool, sp_list, tp_list


if __name__ == "__main__":
    # small shapes consistent with the module: (N, C, T, H, W)
    N, C, T, H, W = 2, 4, 8, 16, 16
    key = jax.random.PRNGKey(0)
    x = jax.random.normal(key, (N, C, T, H, W), dtype=jnp.float32)

    x_pool, inds_spatial, inds_temporal = maxpool4d(x)
    jax.block_until_ready(x_pool)

    To, Ho, Wo = T // 2, H // 2, W // 2

    # ---- pure-JAX reference ---------------------------------------------------
    # spatial 2x2 windows in row-major scan order (dh, dw)
    win = jnp.transpose(
        x.reshape(N, C, T, Ho, 2, Wo, 2), (0, 1, 2, 3, 5, 4, 6)
    ).reshape(N, C, T, Ho, Wo, 4)
    sarg = jnp.argmax(win, axis=-1)                       # first max wins
    ho = jnp.arange(Ho).reshape(1, 1, 1, Ho, 1)
    wo = jnp.arange(Wo).reshape(1, 1, 1, 1, Wo)
    ref_sidx = 2 * ho * W + 2 * wo + (sarg // 2) * W + (sarg % 2)
    sp = win.max(axis=-1)                                 # (N, C, T, Ho, Wo)
    spp = sp.reshape(N, C, To, 2, Ho, Wo)
    targ = jnp.argmax(spp, axis=3)                        # first max wins
    ref_tidx = 2 * jnp.arange(To).reshape(1, 1, To, 1, 1) + targ
    ref_pool = spp.max(axis=3)

    assert x_pool.shape == (N, C, To, Ho, Wo)
    assert inds_spatial.shape == (N, C, T, Ho, Wo)
    assert inds_temporal.shape == (N, C, To, Ho, Wo)
    assert jnp.allclose(x_pool, ref_pool), "pooled values mismatch vs reference"
    assert jnp.array_equal(inds_spatial, ref_sidx.astype(jnp.int32)), "spatial idx mismatch"
    assert jnp.array_equal(inds_temporal, ref_tidx.astype(jnp.int32)), "temporal idx mismatch"

    # module-style Python lists (lazy path, only when a caller needs them)
    _, sp_list, tp_list = maxpool4d(x, as_lists=True)
    assert len(sp_list) == T and sp_list[0].shape == (N, C, Ho, Wo)
    assert len(tp_list) == Ho * Wo and tp_list[0].shape == (N, C, To)

    print("KERNEL_OK")
</pallas_src>

<mosaic_0001>
module attributes {stable_mosaic.version = 11 : i64} {
  func.func @kernel(%arg0: i32, %arg1: i32, %arg2: memref<1x1x64xi32, #tpu.memory_space<vmem>>, %arg3: memref<8x4x4x64xf32, #tpu.memory_space<vmem>>, %arg4: memref<4x4x64xf32, #tpu.memory_space<vmem>>, %arg5: memref<4x4x128xi32, #tpu.memory_space<vmem>>, %arg6: memref<4x4x64xi32, #tpu.memory_space<vmem>>) attributes {dimension_semantics = [#tpu.dimension_semantics<parallel>, #tpu.dimension_semantics<parallel>], iteration_bounds = array<i64: 2, 1>, scalar_prefetch = 0 : i64, scratch_operands = 0 : i64, tpu.core_type = #tpu.core_type<tc>, window_params = [{pipeline_mode = #tpu.pipeline_mode<synchronous>, transform_indices = @transform_0, window_bounds = array<i64: 1, 1, 64>}, {transform_indices = @transform_1, window_bounds = array<i64: 8, 4, 4, 64>}, {transform_indices = @transform_2, window_bounds = array<i64: 4, 4, 64>}, {transform_indices = @transform_3, window_bounds = array<i64: 4, 4, 128>}, {transform_indices = @transform_4, window_bounds = array<i64: 4, 4, 64>}]} {
    %c0 = arith.constant 0 : index
    %c0_0 = arith.constant 0 : index
    %c0_1 = arith.constant 0 : index
    %0 = vector.load %arg2[%c0, %c0_0, %c0_1] : memref<1x1x64xi32, #tpu.memory_space<vmem>>, vector<1x1x64xi32>
    %c0_2 = arith.constant 0 : index
    %c0_3 = arith.constant 0 : index
    %c0_4 = arith.constant 0 : index
    %c0_5 = arith.constant 0 : index
    %1 = vector.load %arg3[%c0_2, %c0_3, %c0_4, %c0_5] : memref<8x4x4x64xf32, #tpu.memory_space<vmem>>, vector<1x4x4x64xf32>
    %2 = vector.shape_cast %1 : vector<1x4x4x64xf32> to vector<4x4x64xf32>
    %c1 = arith.constant 1 : index
    %c0_6 = arith.constant 0 : index
    %c0_7 = arith.constant 0 : index
    %c0_8 = arith.constant 0 : index
    %3 = vector.load %arg3[%c1, %c0_6, %c0_7, %c0_8] : memref<8x4x4x64xf32, #tpu.memory_space<vmem>>, vector<1x4x4x64xf32>
    %4 = vector.shape_cast %3 : vector<1x4x4x64xf32> to vector<4x4x64xf32>
    %c2 = arith.constant 2 : index
    %c0_9 = arith.constant 0 : index
    %c0_10 = arith.constant 0 : index
    %c0_11 = arith.constant 0 : index
    %5 = vector.load %arg3[%c2, %c0_9, %c0_10, %c0_11] : memref<8x4x4x64xf32, #tpu.memory_space<vmem>>, vector<1x4x4x64xf32>
    %6 = vector.shape_cast %5 : vector<1x4x4x64xf32> to vector<4x4x64xf32>
    %c3 = arith.constant 3 : index
    %c0_12 = arith.constant 0 : index
    %c0_13 = arith.constant 0 : index
    %c0_14 = arith.constant 0 : index
    %7 = vector.load %arg3[%c3, %c0_12, %c0_13, %c0_14] : memref<8x4x4x64xf32, #tpu.memory_space<vmem>>, vector<1x4x4x64xf32>
    %8 = vector.shape_cast %7 : vector<1x4x4x64xf32> to vector<4x4x64xf32>
    %9 = arith.cmpf olt, %2, %4 : vector<4x4x64xf32>
    %10 = arith.extui %9 : vector<4x4x64xi1> to vector<4x4x64xi32>
    %11 = arith.cmpf olt, %6, %8 : vector<4x4x64xf32>
    %12 = arith.extui %11 : vector<4x4x64xi1> to vector<4x4x64xi32>
    %13 = arith.maximumf %2, %4 : vector<4x4x64xf32>
    %14 = arith.maximumf %6, %8 : vector<4x4x64xf32>
    %15 = arith.maximumf %13, %14 : vector<4x4x64xf32>
    %16 = arith.cmpf olt, %13, %14 : vector<4x4x64xf32>
    %c16_i32 = arith.constant 16 : i32
    %17 = vector.broadcast %c16_i32 : i32 to vector<4x4x64xi32>
    %18 = arith.addi %17, %12 : vector<4x4x64xi32>
    %19 = arith.select %16, %18, %10 : vector<4x4x64xi1>, vector<4x4x64xi32>
    %20 = vector.broadcast %0 : vector<1x1x64xi32> to vector<4x4x64xi32>
    %21 = arith.addi %20, %19 : vector<4x4x64xi32>
    %c4 = arith.constant 4 : index
    %c0_15 = arith.constant 0 : index
    %c0_16 = arith.constant 0 : index
    %c0_17 = arith.constant 0 : index
    %22 = vector.load %arg3[%c4, %c0_15, %c0_16, %c0_17] : memref<8x4x4x64xf32, #tpu.memory_space<vmem>>, vector<1x4x4x64xf32>
    %23 = vector.shape_cast %22 : vector<1x4x4x64xf32> to vector<4x4x64xf32>
    %c5 = arith.constant 5 : index
    %c0_18 = arith.constant 0 : index
    %c0_19 = arith.constant 0 : index
    %c0_20 = arith.constant 0 : index
    %24 = vector.load %arg3[%c5, %c0_18, %c0_19, %c0_20] : memref<8x4x4x64xf32, #tpu.memory_space<vmem>>, vector<1x4x4x64xf32>
    %25 = vector.shape_cast %24 : vector<1x4x4x64xf32> to vector<4x4x64xf32>
    %c6 = arith.constant 6 : index
    %c0_21 = arith.constant 0 : index
    %c0_22 = arith.constant 0 : index
    %c0_23 = arith.constant 0 : index
    %26 = vector.load %arg3[%c6, %c0_21, %c0_22, %c0_23] : memref<8x4x4x64xf32, #tpu.memory_space<vmem>>, vector<1x4x4x64xf32>
    %27 = vector.shape_cast %26 : vector<1x4x4x64xf32> to vector<4x4x64xf32>
    %c7 = arith.constant 7 : index
    %c0_24 = arith.constant 0 : index
    %c0_25 = arith.constant 0 : index
    %c0_26 = arith.constant 0 : index
    %28 = vector.load %arg3[%c7, %c0_24, %c0_25, %c0_26] : memref<8x4x4x64xf32, #tpu.memory_space<vmem>>, vector<1x4x4x64xf32>
    %29 = vector.shape_cast %28 : vector<1x4x4x64xf32> to vector<4x4x64xf32>
    %30 = arith.cmpf olt, %23, %25 : vector<4x4x64xf32>
    %31 = arith.extui %30 : vector<4x4x64xi1> to vector<4x4x64xi32>
    %32 = arith.cmpf olt, %27, %29 : vector<4x4x64xf32>
    %33 = arith.extui %32 : vector<4x4x64xi1> to vector<4x4x64xi32>
    %34 = arith.maximumf %23, %25 : vector<4x4x64xf32>
    %35 = arith.maximumf %27, %29 : vector<4x4x64xf32>
    %36 = arith.maximumf %34, %35 : vector<4x4x64xf32>
    %37 = arith.cmpf olt, %34, %35 : vector<4x4x64xf32>
    %c16_i32_27 = arith.constant 16 : i32
    %38 = vector.broadcast %c16_i32_27 : i32 to vector<4x4x64xi32>
    %39 = arith.addi %38, %33 : vector<4x4x64xi32>
    %40 = arith.select %37, %39, %31 : vector<4x4x64xi1>, vector<4x4x64xi32>
    %41 = vector.broadcast %0 : vector<1x1x64xi32> to vector<4x4x64xi32>
    %42 = arith.addi %41, %40 : vector<4x4x64xi32>
    %c0_28 = arith.constant 0 : index
    %c0_29 = arith.constant 0 : index
    %c0_30 = arith.constant 0 : index
    %43 = vector.load %arg5[%c0_28, %c0_29, %c0_30] : memref<4x4x128xi32, #tpu.memory_space<vmem>>, vector<4x4x64xi32>
    tpu.vector_store %arg5[%c0_28, %c0_29, %c0_30], %21 {strides = array<i32>} : memref<4x4x128xi32, #tpu.memory_space<vmem>>, vector<4x4x64xi32>,
    %c0_31 = arith.constant 0 : index
    %c0_32 = arith.constant 0 : index
    %c64 = arith.constant 64 : index
    %44 = vector.load %arg5[%c0_31, %c0_32, %c64] : memref<4x4x128xi32, #tpu.memory_space<vmem>>, vector<4x4x64xi32>
    tpu.vector_store %arg5[%c0_31, %c0_32, %c64], %42 {strides = array<i32>} : memref<4x4x128xi32, #tpu.memory_space<vmem>>, vector<4x4x64xi32>,
    %45 = tpu.iota {dimensions = array<i32: 1>} : vector<4x4x64xi32>
    %c4_i32 = arith.constant 4 : i32
    %46 = arith.muli %arg1, %c4_i32 : i32
    %47 = vector.broadcast %46 : i32 to vector<4x4x64xi32>
    %48 = arith.addi %47, %45 : vector<4x4x64xi32>
    %c2_i32 = arith.constant 2 : i32
    %49 = vector.broadcast %c2_i32 : i32 to vector<4x4x64xi32>
    %50 = arith.muli %49, %48 : vector<4x4x64xi32>
    %51 = arith.cmpf olt, %15, %36 : vector<4x4x64xf32>
    %52 = arith.extui %51 : vector<4x4x64xi1> to vector<4x4x64xi32>
    %53 = arith.addi %50, %52 : vector<4x4x64xi32>
    %c0_33 = arith.constant 0 : index
    %c0_34 = arith.constant 0 : index
    %c0_35 = arith.constant 0 : index
    %54 = vector.load %arg6[%c0_33, %c0_34, %c0_35] : memref<4x4x64xi32, #tpu.memory_space<vmem>>, vector<4x4x64xi32>
    tpu.vector_store %arg6[%c0_33, %c0_34, %c0_35], %53 {strides = array<i32>} : memref<4x4x64xi32, #tpu.memory_space<vmem>>, vector<4x4x64xi32>,
    %55 = arith.maximumf %15, %36 : vector<4x4x64xf32>
    %c0_36 = arith.constant 0 : index
    %c0_37 = arith.constant 0 : index
    %c0_38 = arith.constant 0 : index
    %56 = vector.load %arg4[%c0_36, %c0_37, %c0_38] : memref<4x4x64xf32, #tpu.memory_space<vmem>>, vector<4x4x64xf32>
    tpu.vector_store %arg4[%c0_36, %c0_37, %c0_38], %55 {strides = array<i32>} : memref<4x4x64xf32, #tpu.memory_space<vmem>>, vector<4x4x64xf32>,
    return
  }
  func.func @transform_0(%arg0: i32, %arg1: i32) -> (i32, i32, i32) {
    %c0_i32 = arith.constant 0 : i32
    %c0_i32_0 = arith.constant 0 : i32
    %c0_i32_1 = arith.constant 0 : i32
    %c0_i32_2 = arith.constant 0 : i32
    return %c0_i32, %c0_i32_0, %c0_i32_1 : i32, i32, i32
  }
  func.func @transform_1(%arg0: i32, %arg1: i32) -> (i32, i32, i32, i32) {
    %c0_i32 = arith.constant 0 : i32
    %c0_i32_0 = arith.constant 0 : i32
    %c0_i32_1 = arith.constant 0 : i32
    return %c0_i32, %arg0, %arg1, %c0_i32_0 : i32, i32, i32, i32
  }
  func.func @transform_2(%arg0: i32, %arg1: i32) -> (i32, i32, i32) {
    %c0_i32 = arith.constant 0 : i32
    %c0_i32_0 = arith.constant 0 : i32
    return %arg0, %arg1, %c0_i32 : i32, i32, i32
  }
  func.func @transform_3(%arg0: i32, %arg1: i32) -> (i32, i32, i32) {
    %c0_i32 = arith.constant 0 : i32
    %c0_i32_0 = arith.constant 0 : i32
    return %arg0, %arg1, %c0_i32 : i32, i32, i32
  }
  func.func @transform_4(%arg0: i32, %arg1: i32) -> (i32, i32, i32) {
    %c0_i32 = arith.constant 0 : i32
    %c0_i32_0 = arith.constant 0 : i32
    return %arg0, %arg1, %c0_i32 : i32, i32, i32
  }
}

</mosaic_0001>

<bundles_post_ra>
// kernel: _maxpool4d_core.1
= control target key start
LH: loop header
LB: loop body
LE: loop exit
PB: predicated region body
PF: predicated region fallthrough
CT: control target
= control target key end

     0   :  { %s939_s15 = smov 0   ;;  %s941_s16 = smov 0   ;;  %s1150_s0 = inlined_call_operand.vmem [shape: s32[1,1,64], index: 0, kind: input, shape index: {}]   ;;  %s1151_s1 = inlined_call_operand.vmem [shape: f32[8,8,4,64], index: 1, kind: input, shape index: {}]   ;;  %s1152_s2 = inlined_call_operand.vmem [shape: f32[8,4,64], index: 2, kind: output, shape index: {0}]   ;;  %s1153_s3 = inlined_call_operand.vmem [shape: s32[8,4,128], index: 3, kind: output, shape index: {1}]   ;;  %s1154_s4 = inlined_call_operand.vmem [shape: s32[8,4,64], index: 4, kind: output, shape index: {2}]  }
   0x1   :  { %s943_s17 = smov 0   ;;  %s945_s18 = smov 0  }
   0x2   :  { %s947_s19 = smov 0  }
   0x3 LB: > { %s27_s20 = sadd.s32 1, %s906_s18  ;;  %p64_p1 = scmp.ne.s32.totalorder %s898_s16, %s894_s15  ;;  %s910_s19 = sphi %s947_s19, %s15_s19   ;;  %s906_s18 = sphi %s945_s18, %s1158_s18   ;;  %s902_s17 = sphi %s943_s17, %s1157_s17   ;;  %s898_s16 = sphi %s941_s16, %s1156_s16   ;;  %s894_s15 = sphi %s939_s15, %s1155_s15  }
   0x4   : > { %p29_p0 = scmp.ge.s32.totalorder %s27_s20, 2  ;;  %p65_p2 = scmp.eq.s32.totalorder %s910_s19, 0 }
   0x5   : > { %s57_s22 = sadd.s32 1, %s898_s16  ;;  %p786_p5 = scmp.ge.s32.totalorder %s910_s19, 2 }
   0x6   : > { %s1160_s20 = smov (%p29_p0, %s27_s20), 0  ;;  %p66_p3 = por %p65_p2, %p64_p1 }
   0x7   : > { %s52_s21 = ssub.s32 %s906_s18, %s1160_s20  ;;  %177 = sbr.rel (%p786_p5) target bundleno = 26 (0x1a), region = 20 }
   0x8   : > { %p55_p4 = scmp.eq.s32.totalorder %s52_s21, 0 }
   0xa   : > { %s974_s23 = scalar_select %p55_p4, %s898_s16, %s57_s22  }
   0xe   : > { %180 = sbr.rel (!%p66_p3) target bundleno = 26 (0x1a), region = 24  ;;  %s182_s24 = sand.u32 (%p66_p3), 1, %s898_s16  }
   0xf   : > { %s829_s25 = sshll.u32 (%p66_p3), %s906_s18, 4  ;;  %s787_s26 = sshll.u32 (%p66_p3), %s182_s24, 7 }
  0x10   : > { %s982_s29 = scalar_lea.vmem (%p66_p3), %s1151_s1, %s829_s25  ;;  %s184_s30 = scalar_lea.vmem (%p66_p3), [#allocation2], %s787_s26 }
  0x11   : > { %v204_v0 = vld [vmem:[%s982_s29] sm:$0xff] (%p66_p3)   ;;  %v208_v1 = vld [vmem:[%s982_s29 + $0x8] sm:$0xff] (%p66_p3)  }
  0x12   : > { %v212_v2 = vld [vmem:[%s982_s29 + $0x20] sm:$0xff] (%p66_p3)   ;;  %205 = vst [vmem:[%s184_s30] sm:$0xff] (%p66_p3), %v204_v0   ;;  %209 = vst [vmem:[%s184_s30 + $0x8] sm:$0xff] (%p66_p3), %v208_v1   ;;  %v216_v3 = vld [vmem:[%s982_s29 + $0x28] sm:$0xff] (%p66_p3)  }
  0x13   : > { %213 = vst [vmem:[%s184_s30 + $0x10] sm:$0xff] (%p66_p3), %v212_v2   ;;  %v220_v4 = vld [vmem:[%s982_s29 + $0x40] sm:$0xff] (%p66_p3)   ;;  %v224_v5 = vld [vmem:[%s982_s29 + $0x48] sm:$0xff] (%p66_p3)   ;;  %217 = vst [vmem:[%s184_s30 + $0x18] sm:$0xff] (%p66_p3), %v216_v3  }
  0x14   : > { %221 = vst [vmem:[%s184_s30 + $0x20] sm:$0xff] (%p66_p3), %v220_v4   ;;  %225 = vst [vmem:[%s184_s30 + $0x28] sm:$0xff] (%p66_p3), %v224_v5   ;;  %v228_v6 = vld [vmem:[%s982_s29 + $0x60] sm:$0xff] (%p66_p3)   ;;  %v232_v7 = vld [vmem:[%s982_s29 + $0x68] sm:$0xff] (%p66_p3)  }
  0x15   : > { %v236_v8 = vld [vmem:[%s982_s29 + $0x80] sm:$0xff]   ;;  %229 = vst [vmem:[%s184_s30 + $0x30] sm:$0xff] %v228_v6   ;;  %233 = vst [vmem:[%s184_s30 + $0x38] sm:$0xff] %v232_v7   ;;  %v240_v9 = vld [vmem:[%s982_s29 + $0x88] sm:$0xff]  }
  0x16   : > { %237 = vst [vmem:[%s184_s30 + $0x40] sm:$0xff] %v236_v8   ;;  %v244_v10 = vld [vmem:[%s982_s29 + $0xa0] sm:$0xff]   ;;  %v248_v11 = vld [vmem:[%s982_s29 + $0xa8] sm:$0xff]   ;;  %241 = vst [vmem:[%s184_s30 + $0x48] sm:$0xff] %v240_v9  }
  0x17   : > { %245 = vst [vmem:[%s184_s30 + $0x50] sm:$0xff] %v244_v10   ;;  %249 = vst [vmem:[%s184_s30 + $0x58] sm:$0xff] %v248_v11   ;;  %v252_v12 = vld [vmem:[%s982_s29 + $0xc0] sm:$0xff]   ;;  %v256_v13 = vld [vmem:[%s982_s29 + $0xc8] sm:$0xff]  }
  0x18   : > { %v260_v14 = vld [vmem:[%s982_s29 + $0xe0] sm:$0xff]   ;;  %253 = vst [vmem:[%s184_s30 + $0x60] sm:$0xff] %v252_v12   ;;  %257 = vst [vmem:[%s184_s30 + $0x68] sm:$0xff] %v256_v13   ;;  %v264_v15 = vld [vmem:[%s982_s29 + $0xe8] sm:$0xff]  }
  0x19   : > { %261 = vst [vmem:[%s184_s30 + $0x70] sm:$0xff] %v260_v14   ;;  %265 = vst [vmem:[%s184_s30 + $0x78] sm:$0xff] %v264_v15  }
  0x1a PF: > { %p790_p6 = scmp.ge.s32.totalorder %s910_s19, 1  ;;  %p353_p7 = scmp.lt.s32.totalorder %s910_s19, 3 }
  0x1c   : > { %p354_p8 = pnand %p790_p6, %p353_p7 }
  0x1d   : > { %s360_s5 = sand.u32 (!%p354_p8), 1, %s894_s15   ;;  %s792_s6 = sshll.u32 (!%p354_p8), %s902_s17, 2  ;;  %v582_v16 = vlaneseq (!%p354_p8)  ;;  %vm564_vm1 = vcmask (!%p354_p8), 519168   ;;  %v1015_v23 = vld [vmem:[%s1150_s0] ss:$0 sm:$0xff] (!%p354_p8)  ;;  %v912_v28 = vmov (!%p354_p8), 0  }
  0x1e   : > { %357 = sbr.rel (%p354_p8) target bundleno = 174 (0xae), region = 65  ;;  %s791_s7 = sshll.u32 (!%p354_p8), %s360_s5, 7 }
  0x1f   : > { %p406_p9 = scmp.lt.s32.totalorder (!%p354_p8), %s792_s6, 7  ;;  %v583_v17 = vshrl.u32 (!%p354_p8), %v582_v16, 7  ;;  %s1004_s8 = scalar_lea.vmem (!%p354_p8), [#allocation2], %s791_s7 }
  0x20   : > { %v811_v18 = vld [vmem:[%s1004_s8 + $0x40] sm:$0xf] (!%p354_p8)  ;;  %v815_v19 = vld [vmem:[%s1004_s8 + $0x50] sm:$0xf] (!%p354_p8)  ;;  %v813_v37 = vld [vmem:[%s1004_s8 + $0x48] sm:$0xf] (!%p354_p8) }
  0x21   : > { %v819_v20 = vld [vmem:[%s1004_s8 + $0x60] sm:$0xf] (!%p354_p8)  ;;  %v823_v21 = vld [vmem:[%s1004_s8 + $0x70] sm:$0xf] (!%p354_p8)  ;;  %vm520_vm0 = vcmp.lt.f32.partialorder (!%p354_p8), %v811_v18, %v815_v19  ;;  %v536_v22 = vmax.f32 (!%p354_p8), %v811_v18, %v815_v19  ;;  %v1017_v25 = vmul.u32 (!%p354_p8), 2, %v583_v17  ;;  %s913_s22 = smov (!%p354_p8), 64  }
  0x22   : > { %vm528_vm2 = vcmp.lt.f32.partialorder (!%p354_p8), %v819_v20, %v823_v21  ;;  %v540_v24 = vmax.f32 (!%p354_p8), %v819_v20, %v823_v21  ;;  %v433_v26 = vld [vmem:[%s1004_s8] sm:$0xf] (!%p354_p8)  ;;  %v798_v27 = vld [vmem:[%s1004_s8 + $0x10] sm:$0xf] (!%p354_p8)  ;;  %v524_v29 = vsel (!%p354_p8), %vm520_vm0, 1, %v912_v28 }
  0x23   : > { %v532_v30 = vsel (!%p354_p8), %vm528_vm2, 1, %v912_v28  ;;  %v802_v31 = vld [vmem:[%s1004_s8 + $0x20] sm:$0xf] (!%p354_p8)  ;;  %v806_v32 = vld [vmem:[%s1004_s8 + $0x30] sm:$0xf] (!%p354_p8)  ;;  %vm452_vm3 = vcmp.lt.f32.partialorder (!%p354_p8), %v433_v26, %v798_v27  ;;  %v468_v33 = vmax.f32 (!%p354_p8), %v433_v26, %v798_v27 }
  0x24   : > { %v544_v34 = vmax.f32 (!%p354_p8), %v536_v22, %v540_v24  ;;  %vm548_vm4 = vcmp.lt.f32.partialorder (!%p354_p8), %v536_v22, %v540_v24  ;;  %v552_v35 = vadd.s32 (!%p354_p8), 16, %v532_v30  ;;  %v456_v36 = vsel (!%p354_p8), %vm452_vm3, 1, %v912_v28  ;;  %v817_v38 = vld [vmem:[%s1004_s8 + $0x58] sm:$0xf] (!%p354_p8)  ;;  %v821_v40 = vld [vmem:[%s1004_s8 + $0x68] sm:$0xf] (!%p354_p8) }
  0x25   : > { %s1162_s6 = smov (!%p406_p9, %s792_s6), 7  ;;  %vm460_vm5 = vcmp.lt.f32.partialorder %v802_v31, %v806_v32  ;;  %v472_v39 = vmax.f32 %v802_v31, %v806_v32  ;;  %v825_v41 = vld [vmem:[%s1004_s8 + $0x78] sm:$0xf]  ;;  %vm522_vm6 = vcmp.lt.f32.partialorder %v813_v37, %v817_v38  ;;  %v538_v42 = vmax.f32 %v813_v37, %v817_v38  ;;  %v435_v43 = vld [vmem:[%s1004_s8 + $0x8] sm:$0xf] }
  0x26   : > { %s1010_s9 = sshll.u32 %s1162_s6, 2  ;;  %v556_v44 = vsel %vm548_vm4, %v552_v35, %v524_v29  ;;  %v464_v45 = vsel %vm460_vm5, 1, %v912_v28  ;;  %v526_v46 = vsel %vm522_vm6, 1, %v912_v28  ;;  %vm530_vm7 = vcmp.lt.f32.partialorder %v821_v40, %v825_v41  ;;  %v800_v47 = vld [vmem:[%s1004_s8 + $0x18] sm:$0xf] }
  0x27   : > { %v804_v48 = vld [vmem:[%s1004_s8 + $0x28] sm:$0xf]  ;;  %v560_v49 = vadd.s32 %v1015_v23, %v556_v44  ;;  %v476_v50 = vmax.f32 %v468_v33, %v472_v39  ;;  %vm480_vm8 = vcmp.lt.f32.partialorder %v468_v33, %v472_v39  ;;  %v484_v51 = vadd.s32 16, %v464_v45  ;;  %v808_v52 = vld [vmem:[%s1004_s8 + $0x38] sm:$0xf]  ;;  %s1041_s14 = scalar_lea.vmem %s1152_s2, %s1010_s9  ;;  %s1048_s21 = scalar_lea.vmem %s1153_s3, %s1010_s9 }
  0x28   : > { %v534_v53 = vsel %vm530_vm7, 1, %v912_v28  ;;  %v542_v54 = vmax.f32 %v821_v40, %v825_v41  ;;  %vm454_vm9 = vcmp.lt.f32.partialorder %v435_v43, %v800_v47  ;;  %vm462_vm10 = vcmp.lt.f32.partialorder %v804_v48, %v808_v52  ;;  %v812_v58 = vld [vmem:[%s1004_s8 + $0x44] sm:$0xf]  ;;  %v816_v59 = vld [vmem:[%s1004_s8 + $0x54] sm:$0xf]  ;;  %s1057_s26 = scalar_lea.vmem %s1154_s4, %s1010_s9 }
  0x29   : > { %569 = vrot.lane.b32.xlu0 %v560_v49, %s913_s22  ;;  %v488_v55 = vsel %vm480_vm8, %v484_v51, %v456_v36  ;;  %vm588_vm11 = vcmp.lt.f32.partialorder %v476_v50, %v544_v34  ;;  %v604_v56 = vmax.f32 %v476_v50, %v544_v34  ;;  %v554_v57 = vadd.s32 16, %v534_v53  ;;  %v820_v63 = vld [vmem:[%s1004_s8 + $0x64] sm:$0xf]  ;;  %v824_v0 = vld [vmem:[%s1004_s8 + $0x74] sm:$0xf] }
  0x2a   : > { %v496_v60 = vadd.s32 %v1015_v23, %v488_v55  ;;  %v592_v61 = vsel %vm588_vm11, 1, %v912_v28  ;;  %v1061_v62 = vmax.f32 %v538_v42, %v542_v54  ;;  %vm550_vm12 = vcmp.lt.f32.partialorder %v538_v42, %v542_v54  ;;  %v434_v11 = vld [vmem:[%s1004_s8 + $0x4] sm:$0xf]  ;;  %v799_v12 = vld [vmem:[%s1004_s8 + $0x14] sm:$0xf] }
  0x2b   : > { %v596_v1 = vadd.s32 %v592_v61, %v1017_v25  ;;  %608 = vst.msk [vmem:[%s1041_s14] sm:$0xf] %vm564_vm1, %v604_v56  ;;  %v558_v2 = vsel %vm550_vm12, %v554_v57, %v526_v46  ;;  %v458_v3 = vsel %vm454_vm9, 1, %v912_v28  ;;  %v466_v4 = vsel %vm462_vm10, 1, %v912_v28  ;;  %v803_v16 = vld [vmem:[%s1004_s8 + $0x24] sm:$0xf] }
  0x2c   : > { %565 = vst.msk [vmem:[%s1048_s21] sm:$0xf] %vm564_vm1, %v496_v60  ;;  %v562_v5 = vadd.s32 %v1015_v23, %v558_v2  ;;  %v470_v6 = vmax.f32 %v435_v43, %v800_v47  ;;  %v474_v7 = vmax.f32 %v804_v48, %v808_v52  ;;  %v486_v8 = vadd.s32 16, %v466_v4  ;;  %v807_v17 = vld [vmem:[%s1004_s8 + $0x34] sm:$0xf] }
  0x2d   : > { %600 = vst.msk [vmem:[%s1057_s26] sm:$0xf] %vm564_vm1, %v596_v1  ;;  %vm521_vm13 = vcmp.lt.f32.partialorder %v812_v58, %v816_v59  ;;  %vm529_vm14 = vcmp.lt.f32.partialorder %v820_v63, %v824_v0  ;;  %v537_v9 = vmax.f32 %v812_v58, %v816_v59  ;;  %v541_v10 = vmax.f32 %v820_v63, %v824_v0  ;;  %v814_v20 = vld [vmem:[%s1004_s8 + $0x4c] sm:$0xf]  ;;  %v818_v24 = vld [vmem:[%s1004_s8 + $0x5c] sm:$0xf] }
  0x2e   : > { %573 = vrot.lane.b32.xlu1 %v562_v5, %s913_s22  ;;  %v478_v13 = vmax.f32 %v470_v6, %v474_v7  ;;  %vm482_vm15 = vcmp.lt.f32.partialorder %v470_v6, %v474_v7  ;;  %v525_v14 = vsel %vm521_vm13, 1, %v912_v28  ;;  %v533_v15 = vsel %vm529_vm14, 1, %v912_v28  ;;  %v822_v26 = vld [vmem:[%s1004_s8 + $0x6c] sm:$0xf]  ;;  %v826_v27 = vld [vmem:[%s1004_s8 + $0x7c] sm:$0xf] }
  0x2f   : > { %v490_v18 = vsel %vm482_vm15, %v486_v8, %v458_v3  ;;  %vm549_vm0 = vcmp.lt.f32.partialorder %v537_v9, %v541_v10  ;;  %v553_v19 = vadd.s32 16, %v533_v15  ;;  %v545_v22 = vmax.f32 %v537_v9, %v541_v10  ;;  %v436_v38 = vld [vmem:[%s1004_s8 + $0xc] sm:$0xf]  ;;  %v801_v39 = vld [vmem:[%s1004_s8 + $0x1c] sm:$0xf] }
  0x30   : > { %v498_v21 = vadd.s32 %v1015_v23, %v490_v18  ;;  %vm590_vm2 = vcmp.lt.f32.partialorder %v478_v13, %v1061_v62  ;;  %vm453_vm3 = vcmp.lt.f32.partialorder %v434_v11, %v799_v12  ;;  %v606_v30 = vmax.f32 %v478_v13, %v1061_v62  ;;  %v805_v47 = vld [vmem:[%s1004_s8 + $0x2c] sm:$0xf]  ;;  %v809_v48 = vld [vmem:[%s1004_s8 + $0x3c] sm:$0xf] }
  0x31   : > { %v594_v29 = vsel %vm590_vm2, 1, %v912_v28  ;;  %v557_v31 = vsel %vm549_vm0, %v553_v19, %v525_v14  ;;  %vm461_vm4 = vcmp.lt.f32.partialorder %v803_v16, %v807_v17  ;;  %v457_v33 = vsel %vm453_vm3, 1, %v912_v28 }
  0x32   : > { %v561_v32 = vadd.s32 %v1015_v23, %v557_v31  ;;  %v465_v34 = vsel %vm461_vm4, 1, %v912_v28  ;;  %v469_v35 = vmax.f32 %v434_v11, %v799_v12  ;;  %v473_v36 = vmax.f32 %v803_v16, %v807_v17  ;;  %610 = vst.msk [vmem:[%s1041_s14 + $0x8] sm:$0xf] %vm564_vm1, %v606_v30  ;;  %567 = vst.msk [vmem:[%s1048_s21 + $0x8] sm:$0xf] %vm564_vm1, %v498_v21 }
  0x33   : > { %v485_v37 = vadd.s32 16, %v465_v34  ;;  %vm523_vm5 = vcmp.lt.f32.partialorder %v814_v20, %v818_v24  ;;  %vm531_vm6 = vcmp.lt.f32.partialorder %v822_v26, %v826_v27  ;;  %v539_v42 = vmax.f32 %v814_v20, %v818_v24 }
  0x34   : > { %571 = vrot.lane.b32.xlu0 %v561_v32, %s913_s22  ;;  %v527_v40 = vsel %vm523_vm5, 1, %v912_v28  ;;  %v535_v41 = vsel %vm531_vm6, 1, %v912_v28  ;;  %v543_v43 = vmax.f32 %v822_v26, %v826_v27  ;;  %v598_v44 = vadd.s32 %v594_v29, %v1017_v25 }
  0x35   : > { %v477_v45 = vmax.f32 %v469_v35, %v473_v36  ;;  %vm481_vm7 = vcmp.lt.f32.partialorder %v469_v35, %v473_v36  ;;  %v555_v46 = vadd.s32 16, %v535_v41  ;;  %vm455_vm9 = vcmp.lt.f32.partialorder %v436_v38, %v801_v39 }
  0x36   : > { %v489_v49 = vsel %vm481_vm7, %v485_v37, %v457_v33  ;;  %v547_v50 = vmax.f32 %v539_v42, %v543_v43  ;;  %vm551_vm8 = vcmp.lt.f32.partialorder %v539_v42, %v543_v43  ;;  %vm463_vm11 = vcmp.lt.f32.partialorder %v805_v47, %v809_v48  ;;  %602 = vst.msk [vmem:[%s1057_s26 + $0x8] sm:$0xf] %vm564_vm1, %v598_v44 }
  0x37   : > { %v497_v51 = vadd.s32 %v1015_v23, %v489_v49  ;;  %vm589_vm10 = vcmp.lt.f32.partialorder %v477_v45, %v545_v22  ;;  %v605_v52 = vmax.f32 %v477_v45, %v545_v22  ;;  %v559_v53 = vsel %vm551_vm8, %v555_v46, %v527_v40 }
  0x38   : > { %v593_v54 = vsel %vm589_vm10, 1, %v912_v28  ;;  %v563_v55 = vadd.s32 %v1015_v23, %v559_v53  ;;  %v471_v56 = vmax.f32 %v436_v38, %v801_v39  ;;  %v459_v58 = vsel %vm455_vm9, 1, %v912_v28 }
  0x39   : > { %v597_v57 = vadd.s32 %v593_v54, %v1017_v25  ;;  %609 = vst.msk [vmem:[%s1041_s14 + $0x4] sm:$0xf] %vm564_vm1, %v605_v52  ;;  %566 = vst.msk [vmem:[%s1048_s21 + $0x4] sm:$0xf] %vm564_vm1, %v497_v51  ;;  %v467_v59 = vsel %vm463_vm11, 1, %v912_v28  ;;  %v475_v60 = vmax.f32 %v805_v47, %v809_v48  ;;  %vm577_vm14 = vcmask 1043968  }
  0x3a   : > { %575 = vrot.lane.b32.xlu1 %v563_v55, %s913_s22  ;;  %v487_v61 = vadd.s32 16, %v467_v59 }
  0x3b   : > { %601 = vst.msk [vmem:[%s1057_s26 + $0x4] sm:$0xf] %vm564_vm1, %v597_v57  ;;  %v479_v62 = vmax.f32 %v471_v56, %v475_v60  ;;  %vm483_vm12 = vcmp.lt.f32.partialorder %v471_v56, %v475_v60 }
  0x3c   : > { %v491_v63 = vsel %vm483_vm12, %v487_v61, %v459_v58 }
  0x3d   : > { %v499_v0 = vadd.s32 %v1015_v23, %v491_v63  ;;  %vm591_vm13 = vcmp.lt.f32.partialorder %v479_v62, %v547_v50  ;;  %v607_v1 = vmax.f32 %v479_v62, %v547_v50 }
  0x3e   : > { %v595_v2 = vsel %vm591_vm13, 1, %v912_v28 }
  0x3f   : > { %v599_v3 = vadd.s32 %v595_v2, %v1017_v25  ;;  %611 = vst.msk [vmem:[%s1041_s14 + $0xc] sm:$0xf] %vm564_vm1, %v607_v1  ;;  %568 = vst.msk [vmem:[%s1048_s21 + $0xc] sm:$0xf] %vm564_vm1, %v499_v0 }
  0x41   : > { %603 = vst.msk [vmem:[%s1057_s26 + $0xc] sm:$0xf] %vm564_vm1, %v599_v3 }
  0x9b   : > { %v570_v4 = vpop.permute.xlu0 %569 }
  0x9c   : > { %578 = vst.msk [vmem:[%s1048_s21] sm:$0xf] %vm577_vm14, %v570_v4 }
  0xa0   : > { %v574_v5 = vpop.permute.xlu1 %573 }
  0xa1   : > { %580 = vst.msk [vmem:[%s1048_s21 + $0x8] sm:$0xf] %vm577_vm14, %v574_v5 }
  0xa6   : > { %v572_v6 = vpop.permute.xlu0 %571 }
  0xa7   : > { %579 = vst.msk [vmem:[%s1048_s21 + $0x4] sm:$0xf] %vm577_vm14, %v572_v6 }
  0xac   : > { %v576_v23 = vpop.permute.xlu1 %575 }
  0xad   : > { %581 = vst.msk [vmem:[%s1048_s21 + $0xc] sm:$0xf] %vm577_vm14, %v576_v23 }
  0xae PF: > { %s15_s19 = sadd.s32 1, %s910_s19   ;;  %s1155_s15 = smov %s898_s16 }
  0xaf   : > { %p12_p10 = scmp.ge.s32.totalorder %s15_s19, 4   ;;  %s1156_s16 = smov %s974_s23 }
  0xb0   : > { %s1157_s17 = smov %s906_s18  ;;  %s1158_s18 = smov %s1160_s20 }
  0xb1   :  { %14 = sbr.rel (!%p12_p10) target bundleno = 3 (0x3), region = 135 }

</bundles_post_ra>
